<compile_context>
chip_gen: v6e
topology: v6e:2x2x1
jax: 0.10.0
libtpu: 0.0.40
codegen_flags: <defaults>
</compile_context>

<pallas_src>
import functools
import math

import jax
import jax.numpy as jnp
from jax.experimental import pallas as pl
from jax.experimental.pallas import tpu as pltpu


# ----------------------------------------------------------------------------
# Fused FFN kernel: out = ReLU(x @ W1 + b1) @ W2 + b2
# ----------------------------------------------------------------------------

def _ffn_kernel(x_ref, w1_ref, b1_ref, w2_ref, b2_ref, o_ref):
    # First linear + ReLU, accumulated in f32 on the MXU.
    h = jnp.dot(x_ref[...], w1_ref[...], preferred_element_type=jnp.float32)
    h = jnp.maximum(h + b1_ref[...], 0.0)
    # Dropout == identity in eval mode.
    # Second linear; hidden `h` never leaves VMEM.
    y = jnp.dot(h.astype(w2_ref.dtype), w2_ref[...],
                preferred_element_type=jnp.float32)
    o_ref[...] = (y + b2_ref[...]).astype(o_ref.dtype)


def _round_up(x, m):
    return ((x + m - 1) // m) * m


def feedforward(x, w1, b1, w2, b2, *, block_m=512):
    """x: (..., K);  w1: (K, H), b1: (H,);  w2: (H, N), b2: (N,).

    Weights are stored (in_features, out_features), i.e. already transposed
    relative to torch.nn.Linear's (out, in) layout.
    """
    orig_shape = x.shape
    K = orig_shape[-1]
    H = w1.shape[1]
    N = w2.shape[1]

    x2 = x.reshape(-1, K)
    M = x2.shape[0]

    # Row tile: as large as possible (up to block_m), multiple of 8 sublanes.
    tm = min(block_m, _round_up(M, 8))
    m_pad = _round_up(M, tm)
    if m_pad != M:
        x2 = jnp.pad(x2, ((0, m_pad - M), (0, 0)))

    b1_2 = b1.reshape(1, H)
    b2_2 = b2.reshape(1, N)

    out = pl.pallas_call(
        _ffn_kernel,
        out_shape=jax.ShapeDtypeStruct((m_pad, N), x.dtype),
        grid=(m_pad // tm,),
        in_specs=[
            pl.BlockSpec((tm, K), lambda i: (i, 0)),   # activation row tile
            pl.BlockSpec((K, H), lambda i: (0, 0)),    # W1 resident
            pl.BlockSpec((1, H), lambda i: (0, 0)),    # b1
            pl.BlockSpec((H, N), lambda i: (0, 0)),    # W2 resident
            pl.BlockSpec((1, N), lambda i: (0, 0)),    # b2
        ],
        out_specs=pl.BlockSpec((tm, N), lambda i: (i, 0)),
        compiler_params=pltpu.CompilerParams(
            dimension_semantics=("parallel",)),
    )(x2, w1, b1_2, w2, b2_2)

    if m_pad != M:
        out = out[:M]
    return out.reshape(orig_shape[:-1] + (N,))


# ----------------------------------------------------------------------------
# Deterministic parameter init (mirrors torch.nn.Linear default: U(-a, a)
# with a = 1/sqrt(fan_in), stored as (in, out)).
# ----------------------------------------------------------------------------

def init_feedforward_params(key, input_dim, embed_dim, out_dim):
    k1, k2, k3, k4 = jax.random.split(key, 4)
    a1 = 1.0 / math.sqrt(input_dim)
    a2 = 1.0 / math.sqrt(embed_dim)
    return {
        "w1": jax.random.uniform(k1, (input_dim, embed_dim), jnp.float32, -a1, a1),
        "b1": jax.random.uniform(k2, (embed_dim,), jnp.float32, -a1, a1),
        "w2": jax.random.uniform(k3, (embed_dim, out_dim), jnp.float32, -a2, a2),
        "b2": jax.random.uniform(k4, (out_dim,), jnp.float32, -a2, a2),
    }


# ----------------------------------------------------------------------------
# Main
# ----------------------------------------------------------------------------

if __name__ == "__main__":
    B, S = 2, 16
    INPUT_DIM, EMBED_DIM, OUT_DIM = 128, 256, 128   # lane-dense (128-multiples)

    root = jax.random.PRNGKey(0)
    k_params, k_x = jax.random.split(root)

    params = init_feedforward_params(k_params, INPUT_DIM, EMBED_DIM, OUT_DIM)
    x = jax.random.normal(k_x, (B, S, INPUT_DIM), jnp.float32)

    fwd = jax.jit(functools.partial(
        feedforward,
        w1=params["w1"], b1=params["b1"],
        w2=params["w2"], b2=params["b2"]))

    out = fwd(x)
    jax.block_until_ready(out)
    assert out.shape == (B, S, OUT_DIM)

    # Reference check against plain XLA.
    ref = jnp.maximum(x @ params["w1"] + params["b1"], 0.0) @ params["w2"] + params["b2"]
    assert jnp.allclose(out, ref, atol=1e-4, rtol=1e-4), \
        float(jnp.max(jnp.abs(out - ref)))

    print("KERNEL_OK")
</pallas_src>

<mosaic_0001>
module attributes {stable_mosaic.version = 11 : i64} {
  func.func @_ffn_kernel(%arg0: i32, %arg1: memref<32x128xf32, #tpu.memory_space<vmem>>, %arg2: memref<128x256xf32, #tpu.memory_space<vmem>>, %arg3: memref<1x256xf32, #tpu.memory_space<vmem>>, %arg4: memref<256x128xf32, #tpu.memory_space<vmem>>, %arg5: memref<1x128xf32, #tpu.memory_space<vmem>>, %arg6: memref<32x128xf32, #tpu.memory_space<vmem>>) attributes {dimension_semantics = [#tpu.dimension_semantics<parallel>], iteration_bounds = array<i64: 1>, scalar_prefetch = 0 : i64, scratch_operands = 0 : i64, tpu.core_type = #tpu.core_type<tc>, window_params = [{transform_indices = @transform_0, window_bounds = array<i64: 32, 128>}, {pipeline_mode = #tpu.pipeline_mode<synchronous>, transform_indices = @transform_1, window_bounds = array<i64: 128, 256>}, {pipeline_mode = #tpu.pipeline_mode<synchronous>, transform_indices = @transform_2, window_bounds = array<i64: 1, 256>}, {pipeline_mode = #tpu.pipeline_mode<synchronous>, transform_indices = @transform_3, window_bounds = array<i64: 256, 128>}, {pipeline_mode = #tpu.pipeline_mode<synchronous>, transform_indices = @transform_4, window_bounds = array<i64: 1, 128>}, {transform_indices = @transform_5, window_bounds = array<i64: 32, 128>}]} {
    %c0 = arith.constant 0 : index
    %c0_0 = arith.constant 0 : index
    %0 = vector.load %arg1[%c0, %c0_0] : memref<32x128xf32, #tpu.memory_space<vmem>>, vector<32x128xf32>
    %c0_1 = arith.constant 0 : index
    %c0_2 = arith.constant 0 : index
    %1 = vector.load %arg2[%c0_1, %c0_2] : memref<128x256xf32, #tpu.memory_space<vmem>>, vector<128x256xf32>
    %cst = arith.constant dense<0.000000e+00> : vector<32x256xf32>
    %2 = tpu.matmul %0, %1, %cst {dimension_numbers = #tpu.dot_dimension_numbers<[1], [0], [0], [1], [0, 0, 1, 1], [], []>} : vector<32x128xf32>, vector<128x256xf32>, vector<32x256xf32> -> vector<32x256xf32>
    %c0_3 = arith.constant 0 : index
    %c0_4 = arith.constant 0 : index
    %3 = vector.load %arg3[%c0_3, %c0_4] : memref<1x256xf32, #tpu.memory_space<vmem>>, vector<1x256xf32>
    %4 = vector.broadcast %3 : vector<1x256xf32> to vector<32x256xf32>
    %5 = arith.addf %2, %4 : vector<32x256xf32>
    %cst_5 = arith.constant 0.000000e+00 : f32
    %6 = vector.broadcast %cst_5 : f32 to vector<32x256xf32>
    %7 = arith.maximumf %5, %6 : vector<32x256xf32>
    %c0_6 = arith.constant 0 : index
    %c0_7 = arith.constant 0 : index
    %8 = vector.load %arg4[%c0_6, %c0_7] : memref<256x128xf32, #tpu.memory_space<vmem>>, vector<256x128xf32>
    %cst_8 = arith.constant dense<0.000000e+00> : vector<32x128xf32>
    %9 = tpu.matmul %7, %8, %cst_8 {dimension_numbers = #tpu.dot_dimension_numbers<[1], [0], [0], [1], [0, 0, 1, 1], [], []>} : vector<32x256xf32>, vector<256x128xf32>, vector<32x128xf32> -> vector<32x128xf32>
    %c0_9 = arith.constant 0 : index
    %c0_10 = arith.constant 0 : index
    %10 = vector.load %arg5[%c0_9, %c0_10] : memref<1x128xf32, #tpu.memory_space<vmem>>, vector<1x128xf32>
    %11 = vector.broadcast %10 : vector<1x128xf32> to vector<32x128xf32>
    %12 = arith.addf %9, %11 : vector<32x128xf32>
    %c0_11 = arith.constant 0 : index
    %c0_12 = arith.constant 0 : index
    %13 = vector.load %arg6[%c0_11, %c0_12] : memref<32x128xf32, #tpu.memory_space<vmem>>, vector<32x128xf32>
    tpu.vector_store %arg6[%c0_11, %c0_12], %12 {strides = array<i32>} : memref<32x128xf32, #tpu.memory_space<vmem>>, vector<32x128xf32>,
    return
  }
  func.func @transform_0(%arg0: i32) -> (i32, i32) {
    %c0_i32 = arith.constant 0 : i32
    %c0_i32_0 = arith.constant 0 : i32
    return %arg0, %c0_i32 : i32, i32
  }
  func.func @transform_1(%arg0: i32) -> (i32, i32) {
    %c0_i32 = arith.constant 0 : i32
    %c0_i32_0 = arith.constant 0 : i32
    %c0_i32_1 = arith.constant 0 : i32
    return %c0_i32, %c0_i32_0 : i32, i32
  }
  func.func @transform_2(%arg0: i32) -> (i32, i32) {
    %c0_i32 = arith.constant 0 : i32
    %c0_i32_0 = arith.constant 0 : i32
    %c0_i32_1 = arith.constant 0 : i32
    return %c0_i32, %c0_i32_0 : i32, i32
  }
  func.func @transform_3(%arg0: i32) -> (i32, i32) {
    %c0_i32 = arith.constant 0 : i32
    %c0_i32_0 = arith.constant 0 : i32
    %c0_i32_1 = arith.constant 0 : i32
    return %c0_i32, %c0_i32_0 : i32, i32
  }
  func.func @transform_4(%arg0: i32) -> (i32, i32) {
    %c0_i32 = arith.constant 0 : i32
    %c0_i32_0 = arith.constant 0 : i32
    %c0_i32_1 = arith.constant 0 : i32
    return %c0_i32, %c0_i32_0 : i32, i32
  }
  func.func @transform_5(%arg0: i32) -> (i32, i32) {
    %c0_i32 = arith.constant 0 : i32
    %c0_i32_0 = arith.constant 0 : i32
    return %arg0, %c0_i32 : i32, i32
  }
}

</mosaic_0001>

<bundles_post_ra>
// kernel: feedforward.1
= control target key start
LH: loop header
LB: loop body
LE: loop exit
PB: predicated region body
PF: predicated region fallthrough
CT: control target
= control target key end

     0   :  { %10 = vsyncpa [#allocation3], 0  ;;  %s563_s0 = inlined_call_operand.hbm [shape: f32[32,128], index: 0, kind: input, shape index: {}]   ;;  %s564_s1 = inlined_call_operand.hbm [shape: f32[128,256], index: 1, kind: input, shape index: {}]   ;;  %s565_s2 = inlined_call_operand.vmem [shape: f32[1,256], index: 2, kind: input, shape index: {}]   ;;  %s566_s3 = inlined_call_operand.hbm [shape: f32[256,128], index: 3, kind: input, shape index: {}]   ;;  %s567_s4 = inlined_call_operand.vmem [shape: f32[1,128], index: 4, kind: input, shape index: {}]   ;;  %s568_s5 = inlined_call_operand.hbm [shape: f32[32,128], index: 5, kind: output, shape index: {}]  }
   0x1   :  { %11 = vsyncpa [#allocation6], 0 }
   0x2   :  { %12 = vsyncpa [#allocation4], 0  ;;  %s493_s18 = smov [#allocation5]  }
   0x3   :  { %s30_s19 = sshll.u32 %s493_s18, 4  ;;  %s31_s19 = int_to_ptr.vmem [resolvable:$true] %s30_s19 }
   0x4   :  { %s415_s20 = scalar_lea.vmem %s31_s19, 4096  ;;  %p420_p1 = scmp.lt.s32.totalorder %s31_s19, %s31_s19 }
   0x5   :  { %p416_p0 = scmp.ne.s32.totalorder %s31_s19, %s415_s20  ;;  %p421_p2 = scmp.lt.s32.totalorder %s415_s20, %s415_s20 }
   0x7   :  { %p422_p3 = por %p421_p2, %p420_p1 }
   0x9   :  { %p423_p4 = pnand %p422_p3, %p416_p0 }
   0xb   :  { %426 = shalt.err (!%p423_p4)
}
   0xc   :  { %s494_s21 = smov 256   ;;  %s495_s22 = smov 16  }
   0xd   :  { %36 = dma.hbm_to_vmem [thread:$0]  %s564_s1, 4096, %s31_s19, [#allocation6], %s494_s21, %s494_s21, %s495_s22  }
   0xe   :  { %s496_s25 = smov [#allocation2]  }
   0xf   :  { %s18_s26 = sshll.u32 %s496_s25, 4  ;;  %s19_s26 = int_to_ptr.vmem [resolvable:$true] %s18_s26 }
  0x10   :  { %s435_s27 = scalar_lea.vmem %s19_s26, 512  ;;  %p440_p6 = scmp.lt.s32.totalorder %s19_s26, %s19_s26 }
  0x11   :  { %p436_p5 = scmp.ne.s32.totalorder %s19_s26, %s435_s27  ;;  %p441_p7 = scmp.lt.s32.totalorder %s435_s27, %s435_s27 }
  0x13   :  { %p442_p8 = por %p441_p7, %p440_p6 }
  0x15   :  { %p443_p9 = pnand %p442_p8, %p436_p5 }
  0x17   :  { %446 = shalt.err (!%p443_p9)
}
  0x18   :  { %s497_s28 = smov 128   ;;  %s498_s29 = smov 8  }
  0x19   :  { %24 = dma.hbm_to_vmem [thread:$0]  %s563_s0, 512, %s19_s26, [#allocation3], %s497_s28, %s497_s28, %s498_s29  }
  0x1a   :  { %s499_s1 = smov [#allocation7]  }
  0x1b   :  { %s44_s7 = sshll.u32 %s499_s1, 4  ;;  %s45_s7 = int_to_ptr.vmem [resolvable:$true] %s44_s7 }
  0x1c   :  { %s455_s8 = scalar_lea.vmem %s45_s7, 4096  ;;  %p460_p11 = scmp.lt.s32.totalorder %s45_s7, %s45_s7 }
  0x1d   :  { %p456_p10 = scmp.ne.s32.totalorder %s45_s7, %s455_s8  ;;  %p461_p12 = scmp.lt.s32.totalorder %s455_s8, %s455_s8 }
  0x1f   :  { %p462_p13 = por %p461_p12, %p460_p11 }
  0x21   :  { %p463_p0 = pnand %p462_p13, %p456_p10 }
  0x23   :  { %466 = shalt.err (!%p463_p0)
}
  0x24   :  { %50 = dma.hbm_to_vmem [thread:$0]  %s566_s3, 4096, %s45_s7, [#allocation6], %s497_s28, %s497_s28, %s498_s29  }
  0x25   :  { %487 = dma.done.wait [#allocation3], 512  }
  0x26   :  { %488 = vsyncadd [#allocation3], 4294966784 }
  0x27   :  { %489 = dma.done.wait [#allocation6], 8192  }
  0x28   :  { %490 = vsyncadd [#allocation6], 4294959104  ;;  %v500_v0 = vmov 0.0   ;;  %v97_v1 = vld [vmem:[#allocation5 + $0xf8] sm:$0xff]  ;;  %v96_v2 = vld [vmem:[#allocation5 + $0xf0] sm:$0xff]  ;;  %s501_s12 = smov [#allocation8]  }
  0x29   :  { %174 = vmatprep.mubr.f32.mxu0 %v500_v0  ;;  %v95_v3 = vld [vmem:[#allocation5 + $0xe8] sm:$0xff]  ;;  %110 = vmatprep.subr.mxu0 %v97_v1  ;;  %v94_v4 = vld [vmem:[#allocation5 + $0xe0] sm:$0xff]  ;;  %v93_v5 = vld [vmem:[#allocation5 + $0xd8] sm:$0xff]  ;;  %s340_s13 = sshll.u32 %s501_s12, 4  ;;  %s341_s13 = int_to_ptr.vmem [resolvable:$true] %s340_s13 }
  0x2a   :  { %111 = vmatpush1.msra.mxu0 %v96_v2  ;;  %v92_v6 = vld [vmem:[#allocation5 + $0xd0] sm:$0xff]  ;;  %v91_v7 = vld [vmem:[#allocation5 + $0xc8] sm:$0xff]  ;;  %v90_v8 = vld [vmem:[#allocation5 + $0xc0] sm:$0xff]  ;;  %p472_p2 = scmp.lt.s32.totalorder %s341_s13, %s341_s13 }
  0x2b   :  { %112 = vmatprep.subr.mxu0 %v95_v3  ;;  %v89_v9 = vld [vmem:[#allocation5 + $0xb8] sm:$0xff]  ;;  %v88_v10 = vld [vmem:[#allocation5 + $0xb0] sm:$0xff]  ;;  %v87_v11 = vld [vmem:[#allocation5 + $0xa8] sm:$0xff] }
  0x2c   :  { %113 = vmatpush1.msra.mxu0 %v94_v4  ;;  %v86_v12 = vld [vmem:[#allocation5 + $0xa0] sm:$0xff]  ;;  %v85_v13 = vld [vmem:[#allocation5 + $0x98] sm:$0xff]  ;;  %v84_v14 = vld [vmem:[#allocation5 + $0x90] sm:$0xff] }
  0x2d   :  { %114 = vmatprep.subr.mxu0 %v93_v5  ;;  %v83_v15 = vld [vmem:[#allocation5 + $0x88] sm:$0xff]  ;;  %v238_v16 = vld [vmem:[#allocation7 + $0xf8] sm:$0xff]  ;;  %v237_v18 = vld [vmem:[#allocation7 + $0xf0] sm:$0xff] }
  0x2e   :  { %115 = vmatpush1.msra.mxu0 %v92_v6  ;;  %v222_v17 = vld [vmem:[#allocation7 + $0x78] sm:$0xff]  ;;  %v82_v19 = vld [vmem:[#allocation5 + $0x80] sm:$0xff]  ;;  %354 = vmatprep.subr.mxu1 %v238_v16  ;;  %v221_v20 = vld [vmem:[#allocation7 + $0x70] sm:$0xff]  ;;  %v100_v6 = vlaneseq }
  0x2f   :  { %116 = vmatprep.subr.mxu0 %v91_v7  ;;  %v81_v21 = vld [vmem:[#allocation5 + $0x78] sm:$0xff]  ;;  %355 = vmatpush3.msra.mxu1 %v222_v17  ;;  %v236_v22 = vld [vmem:[#allocation7 + $0xe8] sm:$0xff]  ;;  %v80_v23 = vld [vmem:[#allocation5 + $0x70] sm:$0xff] }
  0x30   :  { %117 = vmatpush1.msra.mxu0 %v90_v8  ;;  %356 = vmatprep.subr.mxu1 %v237_v18  ;;  %v220_v24 = vld [vmem:[#allocation7 + $0x68] sm:$0xff]  ;;  %v235_v26 = vld [vmem:[#allocation7 + $0xe0] sm:$0xff]  ;;  %v77_v29 = vld [vmem:[#allocation5 + $0x58] sm:$0xff] }
  0x31   :  { %118 = vmatprep.subr.mxu0 %v89_v9  ;;  %v79_v25 = vld [vmem:[#allocation5 + $0x68] sm:$0xff]  ;;  %357 = vmatpush3.msra.mxu1 %v221_v20  ;;  %v78_v27 = vld [vmem:[#allocation5 + $0x60] sm:$0xff]  ;;  %v234_v30 = vld [vmem:[#allocation7 + $0xd8] sm:$0xff] }
  0x32   :  { %119 = vmatpush1.msra.mxu0 %v88_v10  ;;  %358 = vmatprep.subr.mxu1 %v236_v22  ;;  %v219_v28 = vld [vmem:[#allocation7 + $0x60] sm:$0xff]  ;;  %v76_v31 = vld [vmem:[#allocation5 + $0x50] sm:$0xff]  ;;  %v218_v32 = vld [vmem:[#allocation7 + $0x58] sm:$0xff] }
  0x33   :  { %120 = vmatprep.subr.mxu0 %v87_v11  ;;  %359 = vmatpush3.msra.mxu1 %v220_v24  ;;  %v75_v33 = vld [vmem:[#allocation5 + $0x48] sm:$0xff]  ;;  %v233_v34 = vld [vmem:[#allocation7 + $0xd0] sm:$0xff]  ;;  %v74_v35 = vld [vmem:[#allocation5 + $0x40] sm:$0xff] }
  0x34   :  { %121 = vmatpush1.msra.mxu0 %v86_v12  ;;  %360 = vmatprep.subr.mxu1 %v235_v26  ;;  %v217_v36 = vld [vmem:[#allocation7 + $0x50] sm:$0xff]  ;;  %v73_v37 = vld [vmem:[#allocation5 + $0x38] sm:$0xff]  ;;  %v232_v38 = vld [vmem:[#allocation7 + $0xc8] sm:$0xff] }
  0x35   :  { %122 = vmatprep.subr.mxu0 %v85_v13  ;;  %361 = vmatpush3.msra.mxu1 %v219_v28  ;;  %v72_v39 = vld [vmem:[#allocation5 + $0x30] sm:$0xff]  ;;  %v216_v40 = vld [vmem:[#allocation7 + $0x48] sm:$0xff]  ;;  %v231_v42 = vld [vmem:[#allocation7 + $0xc0] sm:$0xff] }
  0x36   :  { %123 = vmatpush1.msra.mxu0 %v84_v14  ;;  %362 = vmatprep.subr.mxu1 %v234_v30  ;;  %v71_v41 = vld [vmem:[#allocation5 + $0x28] sm:$0xff]  ;;  %v70_v43 = vld [vmem:[#allocation5 + $0x20] sm:$0xff]  ;;  %v69_v45 = vld [vmem:[#allocation5 + $0x18] sm:$0xff] }
  0x37   :  { %124 = vmatprep.subr.mxu0 %v83_v15  ;;  %363 = vmatpush3.msra.mxu1 %v218_v32  ;;  %v215_v44 = vld [vmem:[#allocation7 + $0x40] sm:$0xff]  ;;  %v230_v46 = vld [vmem:[#allocation7 + $0xb8] sm:$0xff]  ;;  %v68_v47 = vld [vmem:[#allocation5 + $0x10] sm:$0xff] }
  0x38   :  { %125 = vmatpush1.msra.mxu0 %v82_v19  ;;  %364 = vmatprep.subr.mxu1 %v233_v34  ;;  %v214_v48 = vld [vmem:[#allocation7 + $0x38] sm:$0xff]  ;;  %v67_v49 = vld [vmem:[#allocation5 + $0x8] sm:$0xff]  ;;  %v229_v50 = vld [vmem:[#allocation7 + $0xb0] sm:$0xff] }
  0x39   :  { %126 = vmatprep.subr.mxu0 %v81_v21  ;;  %365 = vmatpush3.msra.mxu1 %v217_v36  ;;  %v66_v51 = vld [vmem:[#allocation5] sm:$0xff]  ;;  %v213_v52 = vld [vmem:[#allocation7 + $0x30] sm:$0xff]  ;;  %v228_v54 = vld [vmem:[#allocation7 + $0xa8] sm:$0xff] }
  0x3a   :  { %127 = vmatpush1.msra.mxu0 %v80_v23  ;;  %366 = vmatprep.subr.mxu1 %v232_v38  ;;  %v62_v53 = vld [vmem:[#allocation2] sm:$0xff]  ;;  %v212_v55 = vld [vmem:[#allocation7 + $0x28] sm:$0xff]  ;;  %v64_v59 = vld [vmem:[#allocation2 + $0x10] sm:$0xff] }
  0x3b   :  { %128 = vmatprep.subr.mxu0 %v79_v25  ;;  %367 = vmatpush3.msra.mxu1 %v216_v40  ;;  %v227_v56 = vld [vmem:[#allocation7 + $0xa0] sm:$0xff]  ;;  %v63_v58 = vld [vmem:[#allocation2 + $0x8] sm:$0xff]  ;;  %v65_v60 = vld [vmem:[#allocation2 + $0x18] sm:$0xff] }
  0x3c   :  { %129 = vmatpush1.msra.mxu0 %v78_v27  ;;  %368 = vmatprep.subr.mxu1 %v231_v42  ;;  %v211_v57 = vld [vmem:[#allocation7 + $0x20] sm:$0xff]  ;;  %v226_v61 = vld [vmem:[#allocation7 + $0x98] sm:$0xff]  ;;  %v225_v63 = vld [vmem:[#allocation7 + $0x90] sm:$0xff] }
  0x3d   :  { %130 = vmatprep.subr.mxu0 %v77_v29  ;;  %369 = vmatpush3.msra.mxu1 %v215_v44  ;;  %v210_v62 = vld [vmem:[#allocation7 + $0x18] sm:$0xff]  ;;  %v209_v1 = vld [vmem:[#allocation7 + $0x10] sm:$0xff]  ;;  %v224_v2 = vld [vmem:[#allocation7 + $0x88] sm:$0xff] }
  0x3e   :  { %131 = vmatpush1.msra.mxu0 %v76_v31  ;;  %370 = vmatprep.subr.mxu1 %v230_v46  ;;  %v208_v3 = vld [vmem:[#allocation7 + $0x8] sm:$0xff]  ;;  %v223_v4 = vld [vmem:[#allocation7 + $0x80] sm:$0xff] }
  0x3f   :  { %132 = vmatprep.subr.mxu0 %v75_v33  ;;  %371 = vmatpush3.msra.mxu1 %v214_v48  ;;  %v207_v5 = vld [vmem:[#allocation7] sm:$0xff] }
  0x40   :  { %133 = vmatpush1.msra.mxu0 %v74_v35  ;;  %372 = vmatprep.subr.mxu1 %v229_v50  ;;  %v98_v8 = vld [vmem:[%s565_s2] sm:$0x3] }
  0x41   :  { %134 = vmatprep.subr.mxu0 %v73_v37  ;;  %373 = vmatpush3.msra.mxu1 %v213_v52  ;;  %v353_v37 = vld [vmem:[%s567_s4] ss:$0 sm:$0xff]  ;;  %s467_s4 = scalar_lea.vmem %s341_s13, 512 }
  0x42   :  { %135 = vmatpush1.msra.mxu0 %v72_v39  ;;  %374 = vmatprep.subr.mxu1 %v228_v54  ;;  %p468_p1 = scmp.ne.s32.totalorder %s341_s13, %s467_s4  ;;  %p473_p3 = scmp.lt.s32.totalorder %s467_s4, %s467_s4 }
  0x43   :  { %136 = vmatprep.subr.mxu0 %v71_v41  ;;  %375 = vmatpush3.msra.mxu1 %v212_v55 }
  0x44   :  { %137 = vmatpush1.msra.mxu0 %v70_v43  ;;  %376 = vmatprep.subr.mxu1 %v227_v56  ;;  %p474_p4 = por %p473_p3, %p472_p2 }
  0x45   :  { %138 = vmatprep.subr.mxu0 %v69_v45  ;;  %377 = vmatpush3.msra.mxu1 %v211_v57 }
  0x46   :  { %139 = vmatpush1.msra.mxu0 %v68_v47  ;;  %378 = vmatprep.subr.mxu1 %v226_v61  ;;  %p475_p5 = pnand %p474_p4, %p468_p1 }
  0x47   :  { %140 = vmatprep.subr.mxu0 %v67_v49  ;;  %379 = vmatpush3.msra.mxu1 %v210_v62 }
  0x48   :  { %141 = vmatpush1.msra.mxu0 %v66_v51  ;;  %380 = vmatprep.subr.mxu1 %v225_v63 }
  0x49   :  { %175 = vmatmul.mubr.f32.vlgmr.msra.gmra.mxu0 %v62_v53  ;;  %381 = vmatpush3.msra.mxu1 %v209_v1 }
  0x4a   :  { %180 = vmatprep.mubr.f32.mxu0 %v500_v0  ;;  %382 = vmatprep.subr.mxu1 %v224_v2 }
  0x4b   :  { %383 = vmatpush3.msra.mxu1 %v208_v3 }
  0x4c   :  { %384 = vmatprep.subr.mxu1 %v223_v4 }
  0x4d   :  { %181 = vmatmul.mubr.f32.gmra.mxu0 %v63_v58  ;;  %385 = vmatpush3.msra.mxu1 %v207_v5 }
  0x4e   :  { %186 = vmatprep.mubr.f32.mxu0 %v500_v0 }
  0x51   :  { %187 = vmatmul.mubr.f32.gmra.mxu0 %v64_v59 }
  0x52   :  { %192 = vmatprep.mubr.f32.mxu0 %v500_v0  ;;  %v101_v0 = vshrl.u32 %v100_v6, 7 }
  0x54   :  { %v102_v7 = vsub.s32 0, %v101_v0  ;;  %v106_v9 = vsub.s32 1, %v101_v0 }
  0x55   :  { %193 = vmatmul.mubr.f32.gmra.mxu0 %v65_v60 }
  0x56   :  { %v103_v10 = vrot.slane %v98_v8, %v102_v7  ;;  %v107_v11 = vrot.slane %v98_v8, %v106_v9 }
 0x109   :  { %v176_v12 = vpop.f32.mrf.mxu0 }
 0x10a   :  { %v177_v13 = vadd.f32 %v176_v12, %v103_v10 }
 0x10b   :  { %v178_v14 = vpop.f32.mrf.mxu0 }
 0x10c   :  { %v179_v15 = vadd.f32 %v178_v14, %v107_v11  ;;  %v199_v18 = vmax.f32 %v177_v13, 0.0 }
 0x10d   :  { %v182_v16 = vpop.f32.mrf.mxu0 }
 0x10e   :  { %v200_v17 = vmax.f32 %v179_v15, 0.0  ;;  %v183_v19 = vadd.f32 %v182_v16, %v103_v10 }
 0x10f   :  { %v184_v20 = vpop.f32.mrf.mxu0 }
 0x110   :  { %v185_v21 = vadd.f32 %v184_v20, %v107_v11  ;;  %310 = vmatprep.mubr.f32.mxu1 %v200_v17  ;;  %v201_v24 = vmax.f32 %v183_v19, 0.0 }
 0x111   :  { %v188_v22 = vpop.f32.mrf.mxu0  ;;  %311 = vmatmul.mubr.f32.vlgmr.msra.gmra.mxu1 %v199_v18 }
 0x112   :  { %v202_v23 = vmax.f32 %v185_v21, 0.0  ;;  %v189_v25 = vadd.f32 %v188_v22, %v103_v10 }
 0x113   :  { %v190_v26 = vpop.f32.mrf.mxu0 }
 0x114   :  { %v191_v27 = vadd.f32 %v190_v26, %v107_v11  ;;  %315 = vmatprep.mubr.f32.mxu1 %v202_v23  ;;  %v203_v30 = vmax.f32 %v189_v25, 0.0 }
 0x115   :  { %v194_v28 = vpop.f32.mrf.mxu0  ;;  %316 = vmatmul.mubr.f32.gmra.mxu1 %v201_v24 }
 0x116   :  { %v204_v29 = vmax.f32 %v191_v27, 0.0  ;;  %v195_v31 = vadd.f32 %v194_v28, %v103_v10 }
 0x117   :  { %v196_v32 = vpop.f32.mrf.mxu0 }
 0x118   :  { %v197_v33 = vadd.f32 %v196_v32, %v107_v11  ;;  %320 = vmatprep.mubr.f32.mxu1 %v204_v29  ;;  %v205_v35 = vmax.f32 %v195_v31, 0.0 }
 0x119   :  { %321 = vmatmul.mubr.f32.gmra.mxu1 %v203_v30 }
 0x11a   :  { %v206_v34 = vmax.f32 %v197_v33, 0.0 }
 0x11c   :  { %325 = vmatprep.mubr.f32.mxu1 %v206_v34 }
 0x11d   :  { %326 = vmatmul.mubr.f32.gmra.mxu1 %v205_v35 }
 0x1d1   :  { %v386_v36 = vpop.f32.mrf.mxu1 }
 0x1d3   :  { %v387_v38 = vpop.f32.mrf.mxu1 }
 0x1d4   :  { %v388_v39 = vadd.f32 %v387_v38, %v386_v36 }
 0x1d5   :  { %v389_v40 = vpop.f32.mrf.mxu1 }
 0x1d6   :  { %v313_v41 = vadd.f32 %v388_v39, %v353_v37 }
 0x1d7   :  { %v390_v42 = vpop.f32.mrf.mxu1 }
 0x1d8   :  { %331 = vst [vmem:[#allocation8] sm:$0xff] %v313_v41  ;;  %v391_v43 = vadd.f32 %v390_v42, %v389_v40 }
 0x1d9   :  { %v392_v44 = vpop.f32.mrf.mxu1 }
 0x1da   :  { %v318_v45 = vadd.f32 %v391_v43, %v353_v37 }
 0x1db   :  { %v393_v46 = vpop.f32.mrf.mxu1 }
 0x1dc   :  { %332 = vst [vmem:[#allocation8 + $0x8] sm:$0xff] %v318_v45  ;;  %v394_v47 = vadd.f32 %v393_v46, %v392_v44 }
 0x1dd   :  { %v395_v48 = vpop.f32.mrf.mxu1 }
 0x1de   :  { %v323_v49 = vadd.f32 %v394_v47, %v353_v37 }
 0x1df   :  { %v396_v50 = vpop.f32.mrf.mxu1 }
 0x1e0   :  { %333 = vst [vmem:[#allocation8 + $0x10] sm:$0xff] %v323_v49  ;;  %v397_v51 = vadd.f32 %v396_v50, %v395_v48 }
 0x1e2   :  { %v328_v52 = vadd.f32 %v397_v51, %v353_v37 }
 0x1e4   :  { %334 = vst [vmem:[#allocation8 + $0x18] sm:$0xff] %v328_v52 }
 0x1e5   :  { %478 = shalt.err (!%p475_p5)
}
 0x1e6   :  { %346 = dma.vmem_to_hbm [thread:$0]  %s341_s13, 512, %s568_s5, [#allocation4], %s497_s28, %s497_s28, %s498_s29  }
 0x1e7   :  { %491 = dma.done.wait [#allocation4], 512  }
 0x1e8   :  { %492 = vsyncadd [#allocation4], 4294966784 }
 0x1e9   :  { %350 = vsyncpa [#allocation3], 1 }
 0x1ea   :  { %351 = vsyncpa [#allocation6], 1 }
 0x1eb   :  { %352 = vsyncpa [#allocation4], 1 }

</bundles_post_ra>
